<compile_context>
chip_gen: v5e
topology: v5e:2x2
jax: 0.10.0
libtpu: 0.0.40
codegen_flags: <defaults>
</compile_context>

<pallas_src>
import functools

import jax
import jax.numpy as jnp
from jax.experimental import pallas as pl
from jax.experimental.pallas import tpu as pltpu


def _round_up(n, m):
    return ((n + m - 1) // m) * m


def _tpu_defaults():
    """(tile_m, vmem_limit_bytes) per chip generation.

    v5e / v5p / v6e have 128 MiB VMEM per TensorCore -> bigger row tiles amortize the
    ~0.35us per-grid-step overhead; v7x (and unknown chips) get the conservative
    setting that fits 64 MiB physical VMEM with headroom.
    """
    try:
        kind = jax.devices()[0].device_kind.lower()
    except Exception:  # pragma: no cover - defensive, never expected on TPU
        kind = ""
    if "v5" in kind or "v6" in kind:
        return 1024, 96 * 1024 * 1024
    return 512, 48 * 1024 * 1024


# --------------------------------------------------------------------------- kernels
def relation_transform_kernel(x_ref, w_ref, xa_ref):
    """XA[k, row_tile] = x[row_tile] @ W_all[k].  Grid: (row tiles, relations+root)."""
    xa_ref[...] = jnp.dot(
        x_ref[...], w_ref[...], preferred_element_type=jnp.float32
    ).astype(xa_ref.dtype)


def aggregate_kernel(a_ref, xr_ref, xroot_ref, invdeg_ref, b_ref, out_ref, *, apply_relu):
    """out_tile = sum_r (counts[r, tile, :] @ XA[r]) * invdeg[r, tile] + XA[R][tile] + b.

    Grid: axis 0 = destination-row tile (parallel), axis 1 = relation (reduction).
    The output block index is constant across r, so out_ref stays VMEM-resident and is
    used directly as the f32 accumulator (no scratch).
    """
    r = pl.program_id(1)

    # Seed the resident f32 output block with root transform + bias on the first relation.
    @pl.when(r == 0)
    def _():
        out_ref[...] = xroot_ref[...].astype(jnp.float32) + b_ref[...]

    # int8 edge counts -> bf16 on the VPU (HBM stream stays int8), matmul on the MXU,
    # then restore mean semantics with the per-(relation, row) 1/deg scale in f32.
    a = a_ref[...].astype(jnp.float32).astype(jnp.bfloat16)
    partial = jnp.dot(a, xr_ref[...], preferred_element_type=jnp.float32)
    out_ref[...] += partial * invdeg_ref[...]

    if apply_relu:
        @pl.when(r == pl.num_programs(1) - 1)
        def _():
            out_ref[...] = jnp.maximum(out_ref[...], 0.0)


# --------------------------------------------------------------------------- wrappers
def prepare_adjacency(edge_counts, tile_m):
    """Pad + quantize adjacency ONCE (shared by both layers).

    edge_counts: (R, N, N) float32 edge-multiplicity counts, counts[r, dst, src].
    Returns (A_int8 (R, N_pad, N_pad), inv_deg (R, N_pad, 1) f32, tile_m).
    """
    R, N, _ = edge_counts.shape
    tm = min(tile_m, _round_up(N, 8))
    n_pad = _round_up(N, tm)

    deg = edge_counts.sum(axis=2, keepdims=True)               # (R, N, 1)
    inv_deg = 1.0 / jnp.maximum(deg, 1.0)                      # isolated nodes -> rows are 0 anyway

    # int8 counts: halves the dominant HBM stream vs bf16.  Clip guards pathological
    # multi-edges (>127 would need a wider count dtype to keep exact mean semantics).
    c8 = jnp.clip(edge_counts, 0.0, 127.0).astype(jnp.int8)

    A_p = jnp.pad(c8, ((0, 0), (0, n_pad - N), (0, n_pad - N)))
    inv_p = jnp.pad(inv_deg.astype(jnp.float32), ((0, 0), (0, n_pad - N), (0, 0)))
    return A_p, inv_p, tm


def rgcn_layer(A_p, inv_p, tm, x, W_rel, W_root, b, *, apply_relu, vmem_limit):
    """One RGCNConv layer.  Returns (N, H) float32."""
    R, N_pad, _ = A_p.shape
    N, F = x.shape
    H = W_root.shape[1]
    F_pad = _round_up(F, 128)
    H_pad = _round_up(H, 128)          # lane-dense outputs / MXU columns.

    x_p = jnp.pad(x.astype(jnp.float32),
                  ((0, N_pad - N), (0, F_pad - F))).astype(jnp.bfloat16)
    W_all = jnp.concatenate([W_rel.astype(jnp.float32),
                             W_root.astype(jnp.float32)[None]], axis=0)
    W_all = jnp.pad(W_all, ((0, 0), (0, F_pad - F), (0, H_pad - H))).astype(jnp.bfloat16)
    b_p = jnp.pad(b.astype(jnp.float32), (0, H_pad - H)).reshape(1, H_pad)

    # ---- kernel 1: XA[k] = x @ W_all[k], row-tiled so nothing full-N sits in VMEM.
    XA = pl.pallas_call(
        relation_transform_kernel,
        out_shape=jax.ShapeDtypeStruct((R + 1, N_pad, H_pad), jnp.bfloat16),
        grid_spec=pltpu.PrefetchScalarGridSpec(
            num_scalar_prefetch=0,
            grid=(N_pad // tm, R + 1),
            in_specs=[
                pl.BlockSpec((tm, F_pad), lambda i, k: (i, 0)),              # x row tile (reused across k)
                pl.BlockSpec((None, F_pad, H_pad), lambda i, k: (k, 0, 0)),  # W_all[k]
            ],
            out_specs=pl.BlockSpec((None, tm, H_pad), lambda i, k: (k, i, 0)),
        ),
        compiler_params=pltpu.CompilerParams(
            dimension_semantics=("parallel", "parallel"),
            vmem_limit_bytes=vmem_limit),
    )(x_p, W_all)

    # ---- kernel 2: row-tiled aggregation over relations.  XA is passed twice with two
    # BlockSpecs (per-relation stream + root-row tile) — no wrapper-level slices, and
    # VMEM footprint is independent of R.
    kernel = functools.partial(aggregate_kernel, apply_relu=apply_relu)
    out_p = pl.pallas_call(
        kernel,
        out_shape=jax.ShapeDtypeStruct((N_pad, H_pad), jnp.float32),
        grid_spec=pltpu.PrefetchScalarGridSpec(
            num_scalar_prefetch=0,
            grid=(N_pad // tm, R),
            in_specs=[
                pl.BlockSpec((None, tm, N_pad), lambda i, r: (r, i, 0)),     # int8 counts row tile
                pl.BlockSpec((None, N_pad, H_pad), lambda i, r: (r, 0, 0)),  # XA[r] (one relation at a time)
                pl.BlockSpec((None, tm, H_pad), lambda i, r: (R, i, 0)),     # XA[R] root tile
                pl.BlockSpec((None, tm, 1), lambda i, r: (r, i, 0)),         # 1/deg tile
                pl.BlockSpec((1, H_pad), lambda i, r: (0, 0)),               # bias (tiny)
            ],
            out_specs=pl.BlockSpec((tm, H_pad), lambda i, r: (i, 0)),        # resident f32 accumulator
        ),
        compiler_params=pltpu.CompilerParams(
            dimension_semantics=("parallel", "arbitrary"),
            vmem_limit_bytes=vmem_limit),
    )(A_p, XA, XA, inv_p, b_p)

    return out_p[:N, :H]


def rgcn_net_forward(x, edge_counts, params, *, tile_m=None, vmem_limit=None):
    """Full RGCN_Net forward: returns (h, z) like the PyTorch module.

    edge_counts: (R, N, N) float32 edge-multiplicity counts (counts[r, dst, src]).
    """
    tm_default, vmem_default = _tpu_defaults()
    tile_m = tm_default if tile_m is None else tile_m
    vmem_limit = vmem_default if vmem_limit is None else vmem_limit

    # Pad + int8-quantize A once; it is streamed by both layers.
    A_p, inv_p, tm = prepare_adjacency(edge_counts, tile_m)
    h = rgcn_layer(A_p, inv_p, tm, x, params["W1_rel"], params["W1_root"], params["b1"],
                   apply_relu=True, vmem_limit=vmem_limit)
    # Layer 2 is re-padded from the sliced (N, H) h, so padded rows never leak forward.
    z = rgcn_layer(A_p, inv_p, tm, h, params["W2_rel"], params["W2_root"], params["b2"],
                   apply_relu=False, vmem_limit=vmem_limit)
    return h, z


# --------------------------------------------------------------------------- reference
def rgcn_layer_ref(A_mean, x, W_rel, W_root, b):
    agg = jnp.einsum("rnm,mf->rnf", A_mean, x)
    return jnp.einsum("rnf,rfh->nh", agg, W_rel) + x @ W_root + b


def build_edge_counts(src, dst, edge_type, num_nodes, num_relations):
    C = jnp.zeros((num_relations, num_nodes, num_nodes), jnp.float32)
    return C.at[edge_type, dst, src].add(1.0)


def glorot(key, shape):
    fan_in, fan_out = shape[-2], shape[-1]
    lim = (6.0 / (fan_in + fan_out)) ** 0.5
    return jax.random.uniform(key, shape, jnp.float32, -lim, lim)


if __name__ == "__main__":
    # Small synthetic graph standing in for Cora (original: 2708 nodes, 1433 feats, 7 classes).
    N, F_IN, HID, C, R, E = 64, 32, 16, 7, 2, 256

    key = jax.random.PRNGKey(0)
    k_x, k_src, k_dst, k_typ, k_par = jax.random.split(key, 5)

    x = jax.random.normal(k_x, (N, F_IN), jnp.float32)
    src = jax.random.randint(k_src, (E,), 0, N)
    dst = jax.random.randint(k_dst, (E,), 0, N)
    edge_type = jax.random.randint(k_typ, (E,), 0, R)
    counts = build_edge_counts(src, dst, edge_type, N, R)

    pk = jax.random.split(k_par, 4)
    params = {
        "W1_rel": glorot(pk[0], (R, F_IN, HID)),
        "W1_root": glorot(pk[1], (F_IN, HID)),
        "b1": jnp.zeros((HID,), jnp.float32),
        "W2_rel": glorot(pk[2], (R, HID, C)),
        "W2_root": glorot(pk[3], (HID, C)),
        "b2": jnp.zeros((C,), jnp.float32),
    }

    h, z = rgcn_net_forward(x, counts, params)
    jax.block_until_ready((h, z))

    # Correctness check vs. plain-JAX f32 reference (kernel uses bf16 matmul operands
    # with f32 accumulation and f32 mean scaling -> allow ~bf16-level tolerance).
    A_mean = counts / jnp.maximum(counts.sum(axis=2, keepdims=True), 1.0)
    h_ref = jnp.maximum(
        rgcn_layer_ref(A_mean, x, params["W1_rel"], params["W1_root"], params["b1"]), 0.0)
    z_ref = rgcn_layer_ref(A_mean, h, params["W2_rel"], params["W2_root"], params["b2"])
    assert h.shape == (N, HID) and z.shape == (N, C)
    assert jnp.allclose(h, h_ref, atol=5e-2, rtol=5e-2)
    assert jnp.allclose(z, z_ref, atol=5e-2, rtol=5e-2)

    print("KERNEL_OK")
</pallas_src>

<mosaic_0001>
module attributes {stable_mosaic.version = 11 : i64} {
  func.func @relation_transform_kernel(%arg0: i32, %arg1: i32, %arg2: memref<64x128xbf16, #tpu.memory_space<vmem>>, %arg3: memref<1x128x128xbf16, #tpu.memory_space<vmem>>, %arg4: memref<1x64x128xbf16, #tpu.memory_space<vmem>>) attributes {dimension_semantics = [#tpu.dimension_semantics<parallel>, #tpu.dimension_semantics<parallel>], iteration_bounds = array<i64: 1, 3>, scalar_prefetch = 0 : i64, scratch_operands = 0 : i64, tpu.core_type = #tpu.core_type<tc>, window_params = [{transform_indices = @transform_0, window_bounds = array<i64: 64, 128>}, {transform_indices = @transform_1, window_bounds = array<i64: 1, 128, 128>}, {transform_indices = @transform_2, window_bounds = array<i64: 1, 64, 128>}]} {
    %c0 = arith.constant 0 : index
    %c0_0 = arith.constant 0 : index
    %0 = vector.load %arg2[%c0, %c0_0] : memref<64x128xbf16, #tpu.memory_space<vmem>>, vector<64x128xbf16>
    %c0_1 = arith.constant 0 : index
    %c0_2 = arith.constant 0 : index
    %c0_3 = arith.constant 0 : index
    %1 = vector.load %arg3[%c0_1, %c0_2, %c0_3] : memref<1x128x128xbf16, #tpu.memory_space<vmem>>, vector<1x128x128xbf16>
    %2 = vector.shape_cast %1 : vector<1x128x128xbf16> to vector<128x128xbf16>
    %cst = arith.constant dense<0.000000e+00> : vector<64x128xf32>
    %3 = tpu.matmul %0, %2, %cst {dimension_numbers = #tpu.dot_dimension_numbers<[1], [0], [0], [1], [0, 0, 1, 1], [], []>} : vector<64x128xbf16>, vector<128x128xbf16>, vector<64x128xf32> -> vector<64x128xf32>
    %4 = arith.truncf %3 : vector<64x128xf32> to vector<64x128xbf16>
    %c0_4 = arith.constant 0 : index
    %c0_5 = arith.constant 0 : index
    %c0_6 = arith.constant 0 : index
    %5 = vector.load %arg4[%c0_4, %c0_5, %c0_6] : memref<1x64x128xbf16, #tpu.memory_space<vmem>>, vector<1x64x128xbf16>
    %6 = vector.shape_cast %5 : vector<1x64x128xbf16> to vector<64x128xbf16>
    %7 = vector.shape_cast %4 : vector<64x128xbf16> to vector<1x64x128xbf16>
    tpu.vector_store %arg4[%c0_4, %c0_5, %c0_6], %7 {strides = array<i32>} : memref<1x64x128xbf16, #tpu.memory_space<vmem>>, vector<1x64x128xbf16>,
    return
  }
  func.func @transform_0(%arg0: i32, %arg1: i32) -> (i32, i32) {
    %c0_i32 = arith.constant 0 : i32
    %c0_i32_0 = arith.constant 0 : i32
    return %arg0, %c0_i32 : i32, i32
  }
  func.func @transform_1(%arg0: i32, %arg1: i32) -> (i32, i32, i32) {
    %c0_i32 = arith.constant 0 : i32
    %c0_i32_0 = arith.constant 0 : i32
    %c0_i32_1 = arith.constant 0 : i32
    return %arg1, %c0_i32, %c0_i32_0 : i32, i32, i32
  }
  func.func @transform_2(%arg0: i32, %arg1: i32) -> (i32, i32, i32) {
    %c0_i32 = arith.constant 0 : i32
    %c0_i32_0 = arith.constant 0 : i32
    return %arg1, %arg0, %c0_i32 : i32, i32, i32
  }
}

</mosaic_0001>

<bundles_post_ra>
// kernel: tpu_custom_call.1
= control target key start
LH: loop header
LB: loop body
LE: loop exit
PB: predicated region body
PF: predicated region fallthrough
CT: control target
= control target key end

     0   :  { %7 = vsyncpa [#allocation3], 0  ;;  %s997_s0 = inlined_call_operand.hbm [shape: bf16[64,128], index: 0, kind: input, shape index: {}]   ;;  %s998_s1 = inlined_call_operand.hbm [shape: bf16[3,128,128], index: 1, kind: input, shape index: {}]   ;;  %s999_s2 = inlined_call_operand.hbm [shape: bf16[3,64,128], index: 2, kind: output, shape index: {}]  }
   0x1   :  { %8 = vsyncpa [#allocation6], 0 }
   0x2   :  { %10 = vsyncpa [#allocation6 + $0x1], 0 }
   0x3   :  { %11 = vsyncpa [#allocation4], 0 }
   0x4   :  { %13 = vsyncpa [#allocation4 + $0x1], 0  ;;  %s833_s9 = smov 0   ;;  %s835_s10 = smov 0  }
   0x5   :  { %s837_s11 = smov 0   ;;  %s839_s12 = smov 0  }
   0x6   :  { %s841_s13 = smov 0   ;;  %s843_s14 = smov 0  }
   0x7 LB: > { %s462_s15 = sadd.s32 4294967295, %s811_s14   ;;  %s463_s16 = sadd.s32 4294967294, %s811_s14   ;;  %s811_s14 = sphi %s843_s14, %s19_s14   ;;  %s807_s13 = sphi %s841_s13, %s1011_s13   ;;  %s803_s12 = sphi %s839_s12, %s1010_s12   ;;  %s799_s11 = sphi %s837_s11, %s1009_s11   ;;  %s795_s10 = sphi %s835_s10, %s1008_s10   ;;  %s791_s9 = sphi %s833_s9, %s1007_s9  }
   0x8   : > { %p77_p0 = scmp.ne.s32.totalorder %s795_s10, %s791_s9  ;;  %p867_p1 = scmp.eq.s32.totalorder %s462_s15, 0 }
   0x9   : > { %p871_p2 = scmp.eq.s32.totalorder %s462_s15, 2  ;;  %p109_p3 = scmp.eq.s32.totalorder %s463_s16, 2 }
   0xa   : > { %p877_p4 = por %p867_p1, %p77_p0  ;;  %p464_p5 = scmp.ge.s32.totalorder %s811_s14, 1 }
   0xb   : > { %p882_p6 = por %p109_p3, %p77_p0  ;;  %p116_p7 = scmp.lt.s32.totalorder %s811_s14, 4 }
   0xc   : > { %s130_s23 = sshll.u32 %s997_s0, 4  ;;  %s813_s25 = smov [#allocation2]   ;;  %s131_s23 = int_to_ptr.hbm [resolvable:$true] %s130_s23 }
   0xd   : > { %p890_p8 = pnand %p464_p5, %p116_p7  ;;  %s132_s26 = sshll.u32 %s813_s25, 4  ;;  %s133_s26 = int_to_ptr.vmem [resolvable:$true] %s132_s26 }
   0xe   : > { %s814_s27 = smov 64   ;;  %s815_s28 = smov 4  }
   0xf   : > { %p596_p9 = pneg %p890_p8  ;;  %s28_s29 = sadd.s32 1, %s807_s13 }
  0x10   : > { %p29_p11 = scmp.ge.s32.totalorder %s28_s29, 3  ;;  %s64_s30 = sadd.s32 1, %s799_s11 }
  0x11   : > { %p597_p10 = pnand %p596_p9, %p867_p1  ;;  %p71_p12 = scmp.ne.s32.totalorder %s799_s11, %s795_s10 }
  0x12   : > { %p72_p13 = scmp.eq.s32.totalorder %s811_s14, 0  ;;  %s1013_s29 = smov (%p29_p11, %s28_s29), 0 }
  0x13   : > { %599 = dma.hbm_to_vmem [thread:$0]  (!%p597_p10), %s131_s23, 512, %s133_s26, [#allocation3], %s814_s27, %s814_s27, %s815_s28  }
  0x14   : > { %p908_p0 = por %p72_p13, %p71_p12  ;;  %p914_p3 = por %p871_p2, %p71_p12 }
  0x15   : > { %s61_s5 = ssub.s32 %s807_s13, %s1013_s29  ;;  %p609_p5 = scmp.lt.s32.totalorder %s811_s14, 3 }
  0x16   : > { %p62_p7 = scmp.eq.s32.totalorder %s61_s5, 0  ;;  %s146_s6 = sand.u32 1, %s799_s11  }
  0x17   : > { %s467_s7 = sshll.u32 %s146_s6, 6  ;;  %s527_s15 = sshll.u32 %s807_s13, 6 }
  0x18   : > { %s923_s8 = scalar_select %p62_p7, %s799_s11, %s64_s30  }
  0x19   : > { %s155_s22 = scalar_lea.hbm %s998_s1, %s527_s15  ;;  %s150_s23 = scalar_lea.vmem [#allocation5], %s467_s7 }
  0x1a   : > { %s158_s25 = sshll.u32 %s150_s23, 4  ;;  %s156_s18 = sshll.u32 %s155_s22, 4  ;;  %s159_s25 = int_to_ptr.vmem [resolvable:$true] %s158_s25  ;;  %s157_s18 = int_to_ptr.hbm [resolvable:$true] %s156_s18 }
  0x1b   : > { %p601_p2 = pnand %p609_p5, %p908_p0  ;;  %s147_s26 = scalar_lea.sflag [#allocation6], %s146_s6 }
  0x1c   : > { %170 = sbr.rel (%p890_p8) target bundleno = 218 (0xda), region = 28 }
  0x1d   : > { %603 = dma.hbm_to_vmem [thread:$0]  (!%p601_p2), %s157_s18, 1024, %s159_s25, %s147_s26, %s814_s27, %s814_s27, %s815_s28  }
  0x21   : > { %778 = dma.done.wait (%p867_p1), [#allocation3], 512  }
  0x22   : > { %780 = vsyncadd (%p867_p1), [#allocation3], 4294966784  ;;  %s941_s30 = sand.u32 1, %s795_s10  }
  0x23   : > { %s472_s3 = sshll.u32 %s941_s30, 6  ;;  %s178_s5 = scalar_lea.sflag [#allocation6], %s941_s30 }
  0x24   : > { %s945_s6 = scalar_lea.vmem [#allocation5], %s472_s3 }
  0x25   : > { %782 = dma.done.wait (%p877_p4), %s178_s5, 1024  }
  0x26   : > { %784 = vsyncadd (%p877_p4), %s178_s5, 4294966272  ;;  %v539_v0 = vld [vmem:[%s945_s6 + $0x38] sm:$0xff]  ;;  %v538_v1 = vld [vmem:[%s945_s6 + $0x30] sm:$0xff]  ;;  %s473_s17 = sshll.u32 %s941_s30, 5  ;;  %s540_s19 = sshll.u32 %s803_s12, 5 }
  0x27   : > { %301 = vmatpush.bf16.msra.mxu0 %v539_v0  ;;  %564 = vmatpush.bf16.msra.mxu1 %v539_v0  ;;  %v537_v2 = vld [vmem:[%s945_s6 + $0x28] sm:$0xff]  ;;  %v536_v3 = vld [vmem:[%s945_s6 + $0x20] sm:$0xff]  ;;  %v535_v4 = vld [vmem:[%s945_s6 + $0x18] sm:$0xff]  ;;  %s360_s28 = scalar_lea.hbm %s999_s2, %s540_s19  ;;  %s202_s7 = scalar_lea.vmem [#allocation7], %s473_s17 }
  0x28   : > { %565 = vmatpush.bf16.msra.mxu2 %v539_v0  ;;  %566 = vmatpush.bf16.msra.mxu3 %v539_v0  ;;  %v534_v5 = vld [vmem:[%s945_s6 + $0x10] sm:$0xff]  ;;  %v533_v6 = vld [vmem:[%s945_s6 + $0x8] sm:$0xff]  ;;  %v532_v7 = vld [vmem:[%s945_s6] sm:$0xff]  ;;  %s361_s15 = sshll.u32 %s202_s7, 4  ;;  %s363_s16 = sshll.u32 %s360_s28, 4  ;;  %s362_s15 = int_to_ptr.vmem [resolvable:$true] %s361_s15  ;;  %s364_s16 = int_to_ptr.hbm [resolvable:$true] %s363_s16 }
  0x29   : > { %v528_v8 = vld [vmem:[#allocation2] sm:$0xff]  ;;  %v529_v9 = vld [vmem:[#allocation2 + $0x8] sm:$0xff]  ;;  %v530_v10 = vld [vmem:[#allocation2 + $0x10] sm:$0xff]  ;;  %s347_s12 = scalar_lea.sflag [#allocation4], %s941_s30  ;;  %s739_s21 = sshra.s32 %s364_s16, 4  ;;  %s740_s21 = int_to_ptr.hbm [resolvable:$true] %s739_s21 }
  0x2a   : > { %v531_v11 = vld [vmem:[#allocation2 + $0x18] sm:$0xff]  ;;  %s741_s22 = scalar_lea.hbm %s740_s21, 32  ;;  %s745_s18 = scalar_lea.hbm %s999_s2, 96 }
  0x2b   : > { %302 = vmatpush.bf16.msra.mxu0 %v538_v1  ;;  %567 = vmatpush.bf16.msra.mxu1 %v538_v1  ;;  %p742_p1 = scmp.ne.s32.totalorder %s740_s21, %s741_s22  ;;  %p746_p9 = scmp.lt.s32.totalorder %s740_s21, %s999_s2 }
  0x2c   : > { %568 = vmatpush.bf16.msra.mxu2 %v538_v1  ;;  %569 = vmatpush.bf16.msra.mxu3 %v538_v1  ;;  %p747_p10 = scmp.lt.s32.totalorder %s745_s18, %s741_s22 }
  0x2d   : > { %p743_p4 = pnand %p742_p1, %p914_p3 }
  0x2e   : > { %p748_p11 = por %p747_p10, %p746_p9 }
  0x2f   : > { %303 = vmatpush.bf16.msra.mxu0 %v537_v2  ;;  %570 = vmatpush.bf16.msra.mxu1 %v537_v2  ;;  %p744_p8 = pneg %p743_p4 }
  0x30   : > { %571 = vmatpush.bf16.msra.mxu2 %v537_v2  ;;  %572 = vmatpush.bf16.msra.mxu3 %v537_v2 }
  0x31   : > { %p749_p12 = pnand %p748_p11, %p744_p8 }
  0x33   : > { %304 = vmatpush.bf16.msra.mxu0 %v536_v3  ;;  %573 = vmatpush.bf16.msra.mxu1 %v536_v3 }
  0x34   : > { %574 = vmatpush.bf16.msra.mxu2 %v536_v3  ;;  %575 = vmatpush.bf16.msra.mxu3 %v536_v3 }
  0x37   : > { %305 = vmatpush.bf16.msra.mxu0 %v535_v4  ;;  %576 = vmatpush.bf16.msra.mxu1 %v535_v4 }
  0x38   : > { %577 = vmatpush.bf16.msra.mxu2 %v535_v4  ;;  %578 = vmatpush.bf16.msra.mxu3 %v535_v4 }
  0x3b   : > { %306 = vmatpush.bf16.msra.mxu0 %v534_v5  ;;  %579 = vmatpush.bf16.msra.mxu1 %v534_v5 }
  0x3c   : > { %580 = vmatpush.bf16.msra.mxu2 %v534_v5  ;;  %581 = vmatpush.bf16.msra.mxu3 %v534_v5 }
  0x3f   : > { %307 = vmatpush.bf16.msra.mxu0 %v533_v6  ;;  %582 = vmatpush.bf16.msra.mxu1 %v533_v6 }
  0x40   : > { %583 = vmatpush.bf16.msra.mxu2 %v533_v6  ;;  %584 = vmatpush.bf16.msra.mxu3 %v533_v6 }
  0x43   : > { %308 = vmatpush.bf16.msra.mxu0 %v532_v7  ;;  %585 = vmatpush.bf16.msra.mxu1 %v532_v7 }
  0x44   : > { %586 = vmatpush.bf16.msra.mxu2 %v532_v7  ;;  %587 = vmatpush.bf16.msra.mxu3 %v532_v7 }
  0x46   : > { %309 = vmatmul.bf16.vlgmr.msra.gmra.mxu0 %v528_v8  ;;  %314 = vmatmul.bf16.vlgmr.msra.gmra.mxu1 %v529_v9 }
  0x47   : > { %319 = vmatmul.bf16.vlgmr.msra.gmra.mxu2 %v530_v10  ;;  %324 = vmatmul.bf16.vlgmr.msra.gmra.mxu3 %v531_v11 }
  0xc3   : > { %v310_v12 = vpop.f32.mrf.mxu0  ;;  %v315_v13 = vpop.f32.mrf.mxu1 }
  0xca   : > { %v320_v14 = vpop.f32.mrf.mxu2  ;;  %v325_v15 = vpop.f32.mrf.mxu3 }
  0xcb   : > { %v312_v16 = vpop.f32.mrf.mxu0  ;;  %v317_v17 = vpop.f32.mrf.mxu1 }
  0xcc   : > { %v544_v18 = vpack.c.bf16 %v312_v16, %v310_v12  ;;  %v549_v19 = vpack.c.bf16 %v317_v17, %v315_v13 }
  0xce   : > { %545 = vst [vmem:[%s202_s7] sm:$0xff] %v544_v18  }
  0xcf   : > { %561 = vst [vmem:[%s202_s7 + $0x8] sm:$0xff] %v549_v19  }
  0xd2   : > { %v322_v20 = vpop.f32.mrf.mxu2  ;;  %v327_v21 = vpop.f32.mrf.mxu3 }
  0xd3   : > { %v554_v22 = vpack.c.bf16 %v322_v20, %v320_v14  ;;  %v559_v23 = vpack.c.bf16 %v327_v21, %v325_v15 }
  0xd5   : > { %562 = vst [vmem:[%s202_s7 + $0x10] sm:$0xff] %v554_v22  }
  0xd6   : > { %563 = vst [vmem:[%s202_s7 + $0x18] sm:$0xff] %v559_v23  }
  0xd7   : > { %752 = shalt.err (!%p749_p12)
}
  0xd8   : > { %s816_s30 = smov 64   ;;  %s817_s5 = smov 4  }
  0xd9   : > { %594 = dma.vmem_to_hbm [thread:$0]  (%p914_p3), %s362_s15, 512, %s364_s16, %s347_s12, %s816_s30, %s816_s30, %s817_s5  }
  0xda PF: > { %p611_p13 = scmp.ge.s32.totalorder %s811_s14, 2  ;;  %s378_s6 = sand.u32 1, %s791_s9  }
  0xdb   : > { %s379_s17 = scalar_lea.sflag [#allocation4], %s378_s6 }
  0xdc   : > { %p605_p0 = pnand %p611_p13, %p882_p6 }
  0xde   : > { %p606_p5 = pneg %p605_p0 }
  0xe0   : > { %786 = dma.done.wait (%p606_p5), %s379_s17, 512  }
  0xe1   : > { %788 = vsyncadd (%p606_p5), %s379_s17, 4294966784  ;;  %s19_s14 = sadd.s32 1, %s811_s14   ;;  %s1007_s9 = smov %s795_s10 }
  0xe2   : > { %p16_p7 = scmp.ge.s32.totalorder %s19_s14, 5   ;;  %s1008_s10 = smov %s799_s11 }
  0xe3   : > { %s1009_s11 = smov %s923_s8  ;;  %s1010_s12 = smov %s807_s13 }
  0xe4   : > { %s1011_s13 = smov %s1013_s29  ;;  %18 = sbr.rel (!%p16_p7) target bundleno = 7 (0x7), region = 79 }
  0xe9   :  { %385 = vsyncpa [#allocation3], 1 }
  0xea   :  { %387 = vsyncpa [#allocation3 + $0x1], 1 }
  0xeb   :  { %388 = vsyncpa [#allocation6], 1 }
  0xec   :  { %390 = vsyncpa [#allocation6 + $0x1], 1 }
  0xed   :  { %391 = vsyncpa [#allocation4], 1 }
  0xee   :  { %393 = vsyncpa [#allocation4 + $0x1], 1 }

</bundles_post_ra>
